<compile_context>
chip_gen: v6e
topology: v6e:2x2x1
jax: 0.10.0
libtpu: 0.0.40
codegen_flags: <defaults>
</compile_context>

<pallas_src>
import functools
import inspect

import jax
import jax.numpy as jnp
from jax.experimental import pallas as pl
from jax.experimental.pallas import tpu as pltpu


def _round_up(v, m):
    return ((v + m - 1) // m) * m


def _cdiv(a, b):
    return (a + b - 1) // b


def _supports_pipeline_mode():
    # pipeline_mode=pl.Buffered(1) keeps grid-invariant operands single-buffered
    # (halves their VMEM footprint).  Guarded so the script still runs on jax
    # versions without the kwarg.
    if not hasattr(pl, "Buffered"):
        return False
    try:
        return "pipeline_mode" in inspect.signature(pl.BlockSpec).parameters
    except (TypeError, ValueError):
        return False


_SUPPORTS_PIPELINE_MODE = _supports_pipeline_mode()


def _resident_kw():
    if _SUPPORTS_PIPELINE_MODE:
        return {"pipeline_mode": pl.Buffered(1)}
    return {}


def _k_tiling(d_in, *, max_k_block=1024, k_block=512):
    """Contraction-dim tiling: full K for small input_size, 512-wide tiles else."""
    if d_in <= max_k_block:
        return d_in, d_in                # (tk, padded K)
    return k_block, _round_up(d_in, k_block)


def gauss_kernel(x_ref, w_ref, b_ref, noise_ref, mean_ref, var_ref, out_ref,
                 acc_ref):
    # x: (TB, TK); w: (TK, 2*SEG); b: (1, 2*SEG); noise: (1, X); outs: (TB, X)
    k = pl.program_id(1)

    @pl.when(k == 0)
    def _():
        acc_ref[...] = jnp.zeros_like(acc_ref)

    # Fused mean|var matmul on the MXU, f32 accumulation in VMEM scratch.
    acc_ref[...] += jnp.dot(x_ref[...], w_ref[...],
                            preferred_element_type=jnp.float32)

    @pl.when(k == pl.num_programs(1) - 1)
    def _():
        x_dim = mean_ref.shape[-1]
        seg = acc_ref.shape[-1] // 2
        lin = acc_ref[...] + b_ref[...]
        # Lane-aligned split (heads padded to `seg`); only the first x_dim
        # columns of each head are real and only those are stored.
        mean = jnp.tanh(lin[:, :x_dim])                   # EUP
        std = jnp.exp(0.5 * lin[:, seg:seg + x_dim])      # EUP (replaces exp+sqrt)
        out = mean + noise_ref[...] * std                 # VPU
        od = mean_ref.dtype
        mean_ref[...] = mean.astype(od)
        var_ref[...] = (std * std).astype(od)             # == exp(v) up to ULP
        out_ref[...] = out.astype(od)


def prepare_gauss_params(wm, bm, wv, bv, *, matmul_dtype=None,
                         max_k_block=1024, k_block=512):
    """Build fused/padded parameters ONCE (hoisted out of the per-call path).

    wm/wv: (input_size, x_dim)  (transposed vs. torch.nn.Linear.weight)
    bm/bv: (x_dim,)
    """
    d_in, x_dim = wm.shape
    assert wv.shape == (d_in, x_dim)
    seg = _round_up(x_dim, 128)          # lane-aligned column segment per head
    tk, kp = _k_tiling(d_in, max_k_block=max_k_block, k_block=k_block)

    if matmul_dtype is None:
        # bf16 MXU inputs pay off once x/W DMA bytes matter (v6e/v7x native).
        matmul_dtype = jnp.bfloat16 if d_in >= 256 else jnp.float32

    def pad_w(w):
        return jnp.pad(w, ((0, kp - d_in), (0, seg - x_dim)))

    def pad_b(b):
        return jnp.pad(b, (0, seg - x_dim))

    w_fused = jnp.concatenate([pad_w(wm), pad_w(wv)], axis=1).astype(matmul_dtype)
    b_fused = jnp.concatenate([pad_b(bm), pad_b(bv)]).reshape(1, 2 * seg)
    b_fused = b_fused.astype(jnp.float32)   # bias stays f32 (added post-matmul)

    return {
        "w": w_fused,                    # (kp, 2*seg), matmul dtype
        "b": b_fused,                    # (1, 2*seg), f32
        "x_dim": int(x_dim),
        "d_in": int(d_in),
        "seg": int(seg),
        "tk": int(tk),
        "kp": int(kp),
    }


def generation_model_gauss_from_params(x, noise, params, *, block_b=512,
                                       out_dtype=jnp.float32,
                                       min_grid_steps=2):
    """Forward pass of GenerationModelGauss using prepared (fused) params.

    Returns (mean, variance, noise, out_with_noise) like the PyTorch module.
    """
    B, d_in = x.shape
    x_dim = params["x_dim"]
    seg = params["seg"]
    tk = params["tk"]
    kp = params["kp"]
    w = params["w"]
    b = params["b"]
    assert d_in == params["d_in"]

    # ---- batch tiling: minimise padding waste; keep >= 2 grid steps when the
    #      batch is big enough so the "parallel" axis shards across both TCs
    #      on v7x (harmless on v5e/v6e).
    n_steps = max(1, _cdiv(B, block_b))
    if B >= 16:
        n_steps = max(n_steps, min_grid_steps)
    tb = max(8, _round_up(_cdiv(B, n_steps), 8))
    grid_b = _cdiv(B, tb)
    bp = grid_b * tb
    grid_k = kp // tk

    x = x.astype(w.dtype)
    if bp != B or kp != d_in:
        x = jnp.pad(x, ((0, bp - B), (0, kp - d_in)))

    nz = noise.astype(jnp.float32).reshape(1, x_dim)

    # ---- explicit VMEM budget (v7x: 64 MiB physical; v5e default scope 16 MiB)
    itm_in = jnp.dtype(w.dtype).itemsize
    itm_out = jnp.dtype(out_dtype).itemsize
    vmem_needed = (
        2 * tb * tk * itm_in                                   # x (dbl-buffered)
        + (1 if grid_k == 1 else 2) * tk * 2 * seg * itm_in    # fused W
        + 2 * seg * 4 + x_dim * 4                              # bias + noise
        + 2 * 3 * tb * x_dim * itm_out                         # 3 outputs (dbl)
        + tb * 2 * seg * 4                                     # f32 accumulator
    )
    vmem_limit = int(min(64 * 1024 * 1024,
                         max(16 * 1024 * 1024, 2 * vmem_needed)))

    out_struct = jax.ShapeDtypeStruct((bp, x_dim), out_dtype)
    # W is grid-invariant (single-buffer it) only when K is not tiled.
    w_kw = _resident_kw() if grid_k == 1 else {}

    mean, var, out = pl.pallas_call(
        gauss_kernel,
        out_shape=(out_struct, out_struct, out_struct),
        grid_spec=pltpu.PrefetchScalarGridSpec(
            num_scalar_prefetch=0,
            grid=(grid_b, grid_k),
            in_specs=[
                pl.BlockSpec((tb, tk), lambda i, k: (i, k)),              # x tile
                pl.BlockSpec((tk, 2 * seg), lambda i, k: (k, 0), **w_kw),  # fused W
                pl.BlockSpec((1, 2 * seg), lambda i, k: (0, 0),
                             **_resident_kw()),                           # fused bias
                pl.BlockSpec((1, x_dim), lambda i, k: (0, 0),
                             **_resident_kw()),                           # noise row
            ],
            out_specs=[
                pl.BlockSpec((tb, x_dim), lambda i, k: (i, 0)),
                pl.BlockSpec((tb, x_dim), lambda i, k: (i, 0)),
                pl.BlockSpec((tb, x_dim), lambda i, k: (i, 0)),
            ],
            scratch_shapes=[pltpu.VMEM((tb, 2 * seg), jnp.float32)],
        ),
        compiler_params=pltpu.CompilerParams(
            dimension_semantics=("parallel", "arbitrary"),
            vmem_limit_bytes=vmem_limit,
        ),
    )(x, w, b, nz)

    if bp != B:   # only the batch pad (if any) needs slicing off
        mean, var, out = mean[:B], var[:B], out[:B]
    return mean, var, noise, out


def generation_model_gauss(x, wm, bm, wv, bv, noise, *, matmul_dtype=None,
                           **call_kwargs):
    """One-shot convenience wrapper.  For repeated forward calls, call
    prepare_gauss_params() once and reuse it with
    generation_model_gauss_from_params()."""
    params = prepare_gauss_params(wm, bm, wv, bv, matmul_dtype=matmul_dtype)
    return generation_model_gauss_from_params(x, noise, params, **call_kwargs)


if __name__ == "__main__":
    # Small shapes implied by the forward: (batch, input_size) -> (batch, x_dim)
    B, INPUT_SIZE, X_DIM = 8, 32, 16

    key = jax.random.PRNGKey(0)
    k_x, k_wm, k_bm, k_wv, k_bv, k_noise = jax.random.split(key, 6)

    # Deterministic parameter init (uniform, like nn.Linear's default scale).
    bound = 1.0 / (INPUT_SIZE ** 0.5)
    wm = jax.random.uniform(k_wm, (INPUT_SIZE, X_DIM), jnp.float32, -bound, bound)
    bm = jax.random.uniform(k_bm, (X_DIM,), jnp.float32, -bound, bound)
    wv = jax.random.uniform(k_wv, (INPUT_SIZE, X_DIM), jnp.float32, -bound, bound)
    bv = jax.random.uniform(k_bv, (X_DIM,), jnp.float32, -bound, bound)

    x = jax.random.normal(k_x, (B, INPUT_SIZE), jnp.float32)
    # TODO(synk): torch.randn(x_dim) is drawn per forward in PyTorch; it is
    # supplied as a deterministic input here (in-kernel pltpu.prng_* could
    # generate it if per-call sampling inside the kernel is required).
    noise = jax.random.normal(k_noise, (X_DIM,), jnp.float32)

    # Parameter prep hoisted out of the per-call path: built once, reused.
    params = prepare_gauss_params(wm, bm, wv, bv)
    fwd = jax.jit(functools.partial(generation_model_gauss_from_params,
                                    params=params))

    mean, variance, noise_out, out_with_noise = fwd(x, noise)
    jax.block_until_ready((mean, variance, noise_out, out_with_noise))

    # Pure-JAX reference check.
    mean_ref = jnp.tanh(x @ wm + bm)
    var_ref = jnp.exp(x @ wv + bv)
    out_ref = mean_ref + noise * jnp.sqrt(var_ref)
    assert mean.shape == (B, X_DIM) and variance.shape == (B, X_DIM)
    assert out_with_noise.shape == (B, X_DIM)
    assert jnp.allclose(mean, mean_ref, atol=1e-5)
    assert jnp.allclose(variance, var_ref, atol=1e-5, rtol=1e-5)
    assert jnp.allclose(out_with_noise, out_ref, atol=1e-5)

    print("KERNEL_OK")
</pallas_src>

<mosaic_0001>
module attributes {stable_mosaic.version = 11 : i64} {
  func.func @gauss_kernel(%arg0: i32, %arg1: i32, %arg2: memref<8x32xf32, #tpu.memory_space<vmem>>, %arg3: memref<32x256xf32, #tpu.memory_space<vmem>>, %arg4: memref<1x256xf32, #tpu.memory_space<vmem>>, %arg5: memref<1x16xf32, #tpu.memory_space<vmem>>, %arg6: memref<8x16xf32, #tpu.memory_space<vmem>>, %arg7: memref<8x16xf32, #tpu.memory_space<vmem>>, %arg8: memref<8x16xf32, #tpu.memory_space<vmem>>, %arg9: memref<8x256xf32, #tpu.memory_space<vmem>>) attributes {dimension_semantics = [#tpu.dimension_semantics<parallel>, #tpu.dimension_semantics<arbitrary>], iteration_bounds = array<i64: 1, 1>, scalar_prefetch = 0 : i64, scratch_operands = 1 : i64, tpu.core_type = #tpu.core_type<tc>, window_params = [{transform_indices = @transform_0, window_bounds = array<i64: 8, 32>}, {pipeline_mode = #tpu.pipeline_mode<synchronous>, transform_indices = @transform_1, window_bounds = array<i64: 32, 256>}, {pipeline_mode = #tpu.pipeline_mode<synchronous>, transform_indices = @transform_2, window_bounds = array<i64: 1, 256>}, {pipeline_mode = #tpu.pipeline_mode<synchronous>, transform_indices = @transform_3, window_bounds = array<i64: 1, 16>}, {transform_indices = @transform_4, window_bounds = array<i64: 8, 16>}, {transform_indices = @transform_5, window_bounds = array<i64: 8, 16>}, {transform_indices = @transform_6, window_bounds = array<i64: 8, 16>}]} {
    %c0_i32 = arith.constant 0 : i32
    %0 = arith.cmpi eq, %arg1, %c0_i32 : i32
    %1 = arith.extui %0 : i1 to i32
    %c0_i32_0 = arith.constant 0 : i32
    %2 = arith.cmpi ne, %1, %c0_i32_0 : i32
    scf.if %2 {
      %cst_10 = arith.constant 0.000000e+00 : f32
      %12 = vector.broadcast %cst_10 : f32 to vector<8x256xf32>
      %c0_11 = arith.constant 0 : index
      %c0_12 = arith.constant 0 : index
      %13 = vector.load %arg9[%c0_11, %c0_12] : memref<8x256xf32, #tpu.memory_space<vmem>>, vector<8x256xf32>
      tpu.vector_store %arg9[%c0_11, %c0_12], %12 {strides = array<i32>} : memref<8x256xf32, #tpu.memory_space<vmem>>, vector<8x256xf32>,
    } else {
    }
    %c0 = arith.constant 0 : index
    %c0_1 = arith.constant 0 : index
    %3 = vector.load %arg9[%c0, %c0_1] : memref<8x256xf32, #tpu.memory_space<vmem>>, vector<8x256xf32>
    %c0_2 = arith.constant 0 : index
    %c0_3 = arith.constant 0 : index
    %4 = vector.load %arg2[%c0_2, %c0_3] : memref<8x32xf32, #tpu.memory_space<vmem>>, vector<8x32xf32>
    %c0_4 = arith.constant 0 : index
    %c0_5 = arith.constant 0 : index
    %5 = vector.load %arg3[%c0_4, %c0_5] : memref<32x256xf32, #tpu.memory_space<vmem>>, vector<32x256xf32>
    %cst = arith.constant dense<0.000000e+00> : vector<8x256xf32>
    %6 = tpu.matmul %4, %5, %cst {dimension_numbers = #tpu.dot_dimension_numbers<[1], [0], [0], [1], [0, 0, 1, 1], [], []>} : vector<8x32xf32>, vector<32x256xf32>, vector<8x256xf32> -> vector<8x256xf32>
    %7 = arith.addf %3, %6 : vector<8x256xf32>
    %c0_6 = arith.constant 0 : index
    %c0_7 = arith.constant 0 : index
    %8 = vector.load %arg9[%c0_6, %c0_7] : memref<8x256xf32, #tpu.memory_space<vmem>>, vector<8x256xf32>
    tpu.vector_store %arg9[%c0_6, %c0_7], %7 {strides = array<i32>} : memref<8x256xf32, #tpu.memory_space<vmem>>, vector<8x256xf32>,
    %c0_i32_8 = arith.constant 0 : i32
    %9 = arith.cmpi eq, %arg1, %c0_i32_8 : i32
    %10 = arith.extui %9 : i1 to i32
    %c0_i32_9 = arith.constant 0 : i32
    %11 = arith.cmpi ne, %10, %c0_i32_9 : i32
    scf.if %11 {
      %c0_10 = arith.constant 0 : index
      %c0_11 = arith.constant 0 : index
      %12 = vector.load %arg9[%c0_10, %c0_11] : memref<8x256xf32, #tpu.memory_space<vmem>>, vector<8x256xf32>
      %c0_12 = arith.constant 0 : index
      %c0_13 = arith.constant 0 : index
      %13 = vector.load %arg4[%c0_12, %c0_13] : memref<1x256xf32, #tpu.memory_space<vmem>>, vector<1x256xf32>
      %14 = vector.broadcast %13 : vector<1x256xf32> to vector<8x256xf32>
      %15 = arith.addf %12, %14 : vector<8x256xf32>
      %16 = vector.extract_strided_slice %15 {offsets = [0, 0], sizes = [8, 16], strides = [1, 1]} : vector<8x256xf32> to vector<8x16xf32>
      %17 = math.tanh %16 : vector<8x16xf32>
      %18 = vector.extract_strided_slice %15 {offsets = [0, 128], sizes = [8, 16], strides = [1, 1]} : vector<8x256xf32> to vector<8x16xf32>
      %cst_14 = arith.constant 5.000000e-01 : f32
      %19 = vector.broadcast %cst_14 : f32 to vector<8x16xf32>
      %20 = arith.mulf %19, %18 : vector<8x16xf32>
      %21 = math.exp %20 : vector<8x16xf32>
      %c0_15 = arith.constant 0 : index
      %c0_16 = arith.constant 0 : index
      %22 = vector.load %arg5[%c0_15, %c0_16] : memref<1x16xf32, #tpu.memory_space<vmem>>, vector<1x16xf32>
      %23 = vector.broadcast %22 : vector<1x16xf32> to vector<8x16xf32>
      %24 = arith.mulf %23, %21 : vector<8x16xf32>
      %25 = arith.addf %17, %24 : vector<8x16xf32>
      %c0_17 = arith.constant 0 : index
      %c0_18 = arith.constant 0 : index
      %26 = vector.load %arg6[%c0_17, %c0_18] : memref<8x16xf32, #tpu.memory_space<vmem>>, vector<8x16xf32>
      tpu.vector_store %arg6[%c0_17, %c0_18], %17 {strides = array<i32>} : memref<8x16xf32, #tpu.memory_space<vmem>>, vector<8x16xf32>,
      %27 = arith.mulf %21, %21 : vector<8x16xf32>
      %c0_19 = arith.constant 0 : index
      %c0_20 = arith.constant 0 : index
      %28 = vector.load %arg7[%c0_19, %c0_20] : memref<8x16xf32, #tpu.memory_space<vmem>>, vector<8x16xf32>
      tpu.vector_store %arg7[%c0_19, %c0_20], %27 {strides = array<i32>} : memref<8x16xf32, #tpu.memory_space<vmem>>, vector<8x16xf32>,
      %c0_21 = arith.constant 0 : index
      %c0_22 = arith.constant 0 : index
      %29 = vector.load %arg8[%c0_21, %c0_22] : memref<8x16xf32, #tpu.memory_space<vmem>>, vector<8x16xf32>
      tpu.vector_store %arg8[%c0_21, %c0_22], %25 {strides = array<i32>} : memref<8x16xf32, #tpu.memory_space<vmem>>, vector<8x16xf32>,
    } else {
    }
    return
  }
  func.func @transform_0(%arg0: i32, %arg1: i32) -> (i32, i32) {
    %c0_i32 = arith.constant 0 : i32
    return %arg0, %arg1 : i32, i32
  }
  func.func @transform_1(%arg0: i32, %arg1: i32) -> (i32, i32) {
    %c0_i32 = arith.constant 0 : i32
    %c0_i32_0 = arith.constant 0 : i32
    return %arg1, %c0_i32 : i32, i32
  }
  func.func @transform_2(%arg0: i32, %arg1: i32) -> (i32, i32) {
    %c0_i32 = arith.constant 0 : i32
    %c0_i32_0 = arith.constant 0 : i32
    %c0_i32_1 = arith.constant 0 : i32
    return %c0_i32, %c0_i32_0 : i32, i32
  }
  func.func @transform_3(%arg0: i32, %arg1: i32) -> (i32, i32) {
    %c0_i32 = arith.constant 0 : i32
    %c0_i32_0 = arith.constant 0 : i32
    %c0_i32_1 = arith.constant 0 : i32
    return %c0_i32, %c0_i32_0 : i32, i32
  }
  func.func @transform_4(%arg0: i32, %arg1: i32) -> (i32, i32) {
    %c0_i32 = arith.constant 0 : i32
    %c0_i32_0 = arith.constant 0 : i32
    return %arg0, %c0_i32 : i32, i32
  }
  func.func @transform_5(%arg0: i32, %arg1: i32) -> (i32, i32) {
    %c0_i32 = arith.constant 0 : i32
    %c0_i32_0 = arith.constant 0 : i32
    return %arg0, %c0_i32 : i32, i32
  }
  func.func @transform_6(%arg0: i32, %arg1: i32) -> (i32, i32) {
    %c0_i32 = arith.constant 0 : i32
    %c0_i32_0 = arith.constant 0 : i32
    return %arg0, %c0_i32 : i32, i32
  }
}

</mosaic_0001>

<bundles_post_ra>
// kernel: generation_model_gauss_from_params.1
= control target key start
LH: loop header
LB: loop body
LE: loop exit
PB: predicated region body
PF: predicated region fallthrough
CT: control target
= control target key end

     0   :  { %12 = vsyncpa [#allocation4], 0  ;;  %s413_s0 = inlined_call_operand.hbm [shape: f32[8,32], index: 0, kind: input, shape index: {}]   ;;  %s414_s1 = inlined_call_operand.hbm [shape: f32[32,256], index: 1, kind: input, shape index: {}]   ;;  %s415_s2 = inlined_call_operand.vmem [shape: f32[1,256], index: 2, kind: input, shape index: {}]   ;;  %s416_s3 = inlined_call_operand.vmem [shape: f32[1,16], index: 3, kind: input, shape index: {}]   ;;  %s417_s4 = inlined_call_operand.hbm [shape: f32[8,16], index: 4, kind: output, shape index: {0}]   ;;  %s418_s5 = inlined_call_operand.hbm [shape: f32[8,16], index: 5, kind: output, shape index: {1}]   ;;  %s419_s6 = inlined_call_operand.hbm [shape: f32[8,16], index: 6, kind: output, shape index: {2}]  }
   0x1   :  { %13 = vsyncpa [#allocation7], 0 }
   0x2   :  { %14 = vsyncpa [#allocation5], 0 }
   0x3   :  { %15 = vsyncpa [#allocation10], 0  ;;  %s346_s21 = smov [#allocation3]   ;;  %s347_s23 = smov [#allocation6]  }
   0x4   :  { %s22_s22 = sshll.u32 %s346_s21, 4  ;;  %s31_s24 = sshll.u32 %s347_s23, 4  ;;  %s23_s22 = int_to_ptr.vmem [resolvable:$true] %s22_s22  ;;  %s32_s24 = int_to_ptr.vmem [resolvable:$true] %s31_s24 }
   0x5   :  { %s246_s25 = scalar_lea.vmem %s23_s22, 128  ;;  %p251_p1 = scmp.lt.s32.totalorder %s23_s22, %s23_s22 }
   0x6   :  { %p247_p0 = scmp.ne.s32.totalorder %s23_s22, %s246_s25  ;;  %p252_p2 = scmp.lt.s32.totalorder %s246_s25, %s246_s25 }
   0x8   :  { %p253_p3 = por %p252_p2, %p251_p1 }
   0xa   :  { %p254_p4 = pnand %p253_p3, %p247_p0 }
   0xc   :  { %257 = shalt.err (!%p254_p4)
}
   0xd   :  { %25 = dma.hbm_to_vmem [thread:$0]  %s413_s0, 128, %s23_s22, [#allocation4]  }
   0xe   :  { %s266_s28 = scalar_lea.vmem %s32_s24, 1024  ;;  %p271_p6 = scmp.lt.s32.totalorder %s32_s24, %s32_s24 }
   0xf   :  { %p267_p5 = scmp.ne.s32.totalorder %s32_s24, %s266_s28  ;;  %p272_p7 = scmp.lt.s32.totalorder %s266_s28, %s266_s28 }
  0x11   :  { %p273_p8 = por %p272_p7, %p271_p6 }
  0x13   :  { %p274_p9 = pnand %p273_p8, %p267_p5 }
  0x15   :  { %277 = shalt.err (!%p274_p9)
}
  0x16   :  { %s348_s29 = smov 256   ;;  %s349_s30 = smov 16  }
  0x17   :  { %37 = dma.hbm_to_vmem [thread:$0]  %s414_s1, 1024, %s32_s24, [#allocation7], %s348_s29, %s348_s29, %s349_s30  }
  0x18   :  { %338 = dma.done.wait [#allocation4], 128  }
  0x19   :  { %339 = vsyncadd [#allocation4], 4294967168 }
  0x1a   :  { %340 = dma.done.wait [#allocation7], 1024  }
  0x1b   :  { %341 = vsyncadd [#allocation7], 4294966272  ;;  %v350_v0 = vmov 0.0   ;;  %v64_v1 = vld [vmem:[#allocation6 + $0x38] sm:$0xff]  ;;  %v63_v2 = vld [vmem:[#allocation6 + $0x30] sm:$0xff]  ;;  %vm65_vm0 = vcmask 261120   ;;  %v151_v10 = vlaneseq }
  0x1c   :  { %133 = vmatprep.mubr.f32.mxu0 %v350_v0  ;;  %v62_v3 = vld [vmem:[#allocation6 + $0x28] sm:$0xff]  ;;  %93 = vmatprep.subr.mxu0 %v64_v1  ;;  %v61_v4 = vld [vmem:[#allocation6 + $0x20] sm:$0xff]  ;;  %v60_v5 = vld [vmem:[#allocation6 + $0x18] sm:$0xff]  ;;  %s351_s9 = smov [#allocation8]   ;;  %vm176_vm1 = vcmask 130048  }
  0x1d   :  { %94 = vmatpush1.msra.mxu0 %v63_v2  ;;  %v59_v6 = vld [vmem:[#allocation6 + $0x10] sm:$0xff]  ;;  %v58_v7 = vld [vmem:[#allocation6 + $0x8] sm:$0xff]  ;;  %v57_v8 = vld [vmem:[#allocation6] sm:$0xff]  ;;  %v152_v11 = vshrl.u32 %v151_v10, 7  ;;  %s187_s10 = sshll.u32 %s351_s9, 4  ;;  %s188_s10 = int_to_ptr.vmem [resolvable:$true] %s187_s10 }
  0x1e   :  { %95 = vmatprep.subr.mxu0 %v62_v3  ;;  %v56_v9 = vld [vmem:[#allocation3] sm:$0xff]  ;;  %s278_s11 = scalar_lea.vmem %s188_s10, 128  ;;  %p283_p11 = scmp.lt.s32.totalorder %s188_s10, %s188_s10 }
  0x1f   :  { %96 = vmatpush1.msra.mxu0 %v61_v4  ;;  %v153_v12 = vsub.s32 0, %v152_v11  ;;  %v149_v13 = vld [vmem:[%s415_s2] sm:$0x3]  ;;  %v157_v14 = vsub.s32 1, %v152_v11  ;;  %p279_p10 = scmp.ne.s32.totalorder %s188_s10, %s278_s11  ;;  %p284_p12 = scmp.lt.s32.totalorder %s278_s11, %s278_s11 }
  0x20   :  { %97 = vmatprep.subr.mxu0 %v60_v5 }
  0x21   :  { %98 = vmatpush1.msra.mxu0 %v59_v6  ;;  %v154_v15 = vrot.slane %v149_v13, %v153_v12  ;;  %v158_v16 = vrot.slane %v149_v13, %v157_v14  ;;  %p285_p13 = por %p284_p12, %p283_p11 }
  0x22   :  { %99 = vmatprep.subr.mxu0 %v58_v7 }
  0x23   :  { %100 = vmatpush1.msra.mxu0 %v57_v8  ;;  %p286_p0 = pnand %p285_p13, %p279_p10 }
  0x24   :  { %224 = vmatmul.mubr.msk.f32.vlgmr.msra.gmra.mxu0 %vm65_vm0, %v56_v9 }
  0xe4   :  { %v135_v17 = vpop.f32.mrf.mxu0 }
  0xe5   :  { %v161_v18 = vadd.f32 %v154_v15, %v135_v17 }
  0xe6   :  { %v137_v19 = vpop.f32.mrf.mxu0 }
  0xe7   :  { %234 = vtanh.f32 %v161_v18  ;;  %v162_v20 = vadd.f32 %v158_v16, %v137_v19 }
  0xe9   :  { %v164_v21 = vmul.f32 0.5, %v162_v20 }
  0xeb   :  { %v165_v22 = vmul.f32 1.442695, %v164_v21 }
  0xed   :  { %236 = vpow2.f32 %v165_v22 }
  0xf4   :  { %v235_v23 = vpop.eup %234 }
  0xf5   :  { %177 = vst.msk [vmem:[#allocation8] sm:$0xff] %vm176_vm1, %v235_v23 }
  0xf6   :  { %289 = shalt.err (!%p286_p0)
}
  0xf7   :  { %190 = dma.vmem_to_hbm [thread:$0]  %s188_s10, 128, %s417_s4, [#allocation5]   ;;  %v225_v24 = vld [vmem:[%s416_s3] ss:$0 sm:$0xff] }
  0xf8   :  { %s352_s13 = smov [#allocation9]   ;;  %s353_s17 = smov [#allocation11]  }
  0xf9   :  { %s197_s14 = sshll.u32 %s352_s13, 4  ;;  %s207_s18 = sshll.u32 %s353_s17, 4  ;;  %s198_s14 = int_to_ptr.vmem [resolvable:$true] %s197_s14  ;;  %s208_s18 = int_to_ptr.vmem [resolvable:$true] %s207_s18 }
  0xfa   :  { %v237_v25 = vpop.eup %236  ;;  %s298_s19 = scalar_lea.vmem %s198_s14, 128  ;;  %p303_p2 = scmp.lt.s32.totalorder %s198_s14, %s198_s14 }
  0xfb   :  { %v178_v26 = vmul.f32 %v237_v25, %v237_v25  ;;  %v174_v27 = vmul.f32 %v237_v25, %v225_v24  ;;  %p299_p1 = scmp.ne.s32.totalorder %s198_s14, %s298_s19  ;;  %p304_p3 = scmp.lt.s32.totalorder %s298_s19, %s298_s19 }
  0xfd   :  { %179 = vst.msk [vmem:[#allocation9] sm:$0xff] %vm176_vm1, %v178_v26  ;;  %v175_v28 = vadd.f32 %v235_v23, %v174_v27  ;;  %p305_p4 = por %p304_p3, %p303_p2 }
  0xff   :  { %p306_p5 = pnand %p305_p4, %p299_p1 }
 0x101   :  { %309 = shalt.err (!%p306_p5)
}
 0x102   :  { %200 = dma.vmem_to_hbm [thread:$0]  %s198_s14, 128, %s418_s5, [#allocation10]   ;;  %180 = vst.msk [vmem:[#allocation11] sm:$0xff] %vm176_vm1, %v175_v28 }
 0x103   :  { %s318_s3 = scalar_lea.vmem %s208_s18, 128  ;;  %p323_p7 = scmp.lt.s32.totalorder %s208_s18, %s208_s18 }
 0x104   :  { %p319_p6 = scmp.ne.s32.totalorder %s208_s18, %s318_s3  ;;  %p324_p8 = scmp.lt.s32.totalorder %s318_s3, %s318_s3 }
 0x106   :  { %p325_p9 = por %p324_p8, %p323_p7 }
 0x108   :  { %p326_p10 = pnand %p325_p9, %p319_p6 }
 0x10a   :  { %329 = shalt.err (!%p326_p10)
}
 0x10b   :  { %210 = dma.vmem_to_hbm [thread:$0]  %s208_s18, 128, %s419_s6, [#allocation10]  }
 0x10c   :  { %342 = dma.done.wait [#allocation5], 128  }
 0x10d   :  { %343 = vsyncadd [#allocation5], 4294967168 }
 0x10e   :  { %344 = dma.done.wait [#allocation10], 256  }
 0x10f   :  { %345 = vsyncadd [#allocation10], 4294967040 }
 0x110   :  { %220 = vsyncpa [#allocation4], 1 }
 0x111   :  { %221 = vsyncpa [#allocation7], 1 }
 0x112   :  { %222 = vsyncpa [#allocation5], 1 }
 0x113   :  { %223 = vsyncpa [#allocation10], 1 }

</bundles_post_ra>
